<compile_context>
chip_gen: v7x
topology: tpu7x:2x2x1
jax: 0.10.0
libtpu: 0.0.40
codegen_flags: <defaults>
</compile_context>

<pallas_src>
import jax
import jax.numpy as jnp
from jax.experimental import pallas as pl
from jax.experimental.pallas import tpu as pltpu


def matmul_relu_kernel(x_ref, w_ref, o_ref):
    # Hot path: MXU matmul (f32 accumulate) + VPU relu, fused in one kernel.
    acc = jnp.dot(x_ref[...], w_ref[...], preferred_element_type=jnp.float32)
    o_ref[...] = jnp.maximum(acc, 0.0).astype(o_ref.dtype)


def matmul_relu(x, w, *, tm=1024):
    """relu(x @ w) with a tiled Pallas kernel. Handles arbitrary M via padding."""
    M, K = x.shape
    Kw, N = w.shape
    assert K == Kw, f"feature dim mismatch: {K} vs {Kw}"

    # Tile choice: as large as possible (up to tm) but no larger than M rounded
    # up to the 8-row sublane granularity, so tiny batches don't pad to 1024.
    m_rounded = max(8, ((M + 7) // 8) * 8)
    tile = min(tm, m_rounded)

    m_pad = pl.cdiv(M, tile) * tile
    if m_pad != M:
        x = jnp.pad(x, ((0, m_pad - M), (0, 0)))

    grid = (m_pad // tile,)

    out = pl.pallas_call(
        matmul_relu_kernel,
        out_shape=jax.ShapeDtypeStruct((m_pad, N), x.dtype),
        grid_spec=pl.GridSpec(
            grid=grid,
            in_specs=[
                # x: one (tile, K) row-block per grid step.
                pl.BlockSpec((tile, K), lambda i: (i, 0)),
                # weight: constant index_map -> single 64 KiB DMA, resident in VMEM.
                pl.BlockSpec((K, N), lambda i: (0, 0)),
            ],
            out_specs=pl.BlockSpec((tile, N), lambda i: (i, 0)),
        ),
        compiler_params=pltpu.CompilerParams(
            # M axis is independent across steps -> megacore sharding on v7x.
            dimension_semantics=("parallel",),
        ),
    )(x, w)

    if m_pad != M:
        out = out[:M]
    return out


class MyModelPallas:
    """JAX/Pallas equivalent of the PyTorch MyModel: relu(x @ weight)."""

    def __init__(self, key):
        # Deterministic init mirroring torch.randn(128, 128).
        self.weight = jax.random.normal(key, (128, 128), dtype=jnp.float32)

    def __call__(self, x):
        return matmul_relu(x, self.weight)


if __name__ == "__main__":
    key = jax.random.PRNGKey(0)
    k_w, k_x1, k_x2 = jax.random.split(key, 3)

    model = MyModelPallas(k_w)

    # Small batch matching the module's 128-wide weight.
    x_small = jax.random.normal(k_x1, (8, 128), dtype=jnp.float32)
    out_small = model(x_small)
    jax.block_until_ready(out_small)
    ref_small = jnp.maximum(x_small @ model.weight, 0.0)
    assert out_small.shape == (8, 128)
    assert jnp.allclose(out_small, ref_small, atol=1e-5, rtol=1e-5)

    # Non-tile-multiple M to exercise the padding path.
    x_odd = jax.random.normal(k_x2, (1000, 128), dtype=jnp.float32)
    out_odd = model(x_odd)
    jax.block_until_ready(out_odd)
    ref_odd = jnp.maximum(x_odd @ model.weight, 0.0)
    assert out_odd.shape == (1000, 128)
    assert jnp.allclose(out_odd, ref_odd, atol=1e-5, rtol=1e-5)

    print("KERNEL_OK")
</pallas_src>

<mosaic_0001>
module attributes {stable_mosaic.version = 11 : i64} {
  func.func @matmul_relu_kernel(%arg0: i32, %arg1: memref<8x128xf32, #tpu.memory_space<vmem>>, %arg2: memref<128x128xf32, #tpu.memory_space<vmem>>, %arg3: memref<8x128xf32, #tpu.memory_space<vmem>>) attributes {dimension_semantics = [#tpu.dimension_semantics<parallel>], iteration_bounds = array<i64: 1>, scalar_prefetch = 0 : i64, scratch_operands = 0 : i64, tpu.core_type = #tpu.core_type<tc>, window_params = [{transform_indices = @transform_0, window_bounds = array<i64: 8, 128>}, {pipeline_mode = #tpu.pipeline_mode<synchronous>, transform_indices = @transform_1, window_bounds = array<i64: 128, 128>}, {transform_indices = @transform_2, window_bounds = array<i64: 8, 128>}]} {
    %c0 = arith.constant 0 : index
    %c0_0 = arith.constant 0 : index
    %0 = vector.load %arg1[%c0, %c0_0] : memref<8x128xf32, #tpu.memory_space<vmem>>, vector<8x128xf32>
    %c0_1 = arith.constant 0 : index
    %c0_2 = arith.constant 0 : index
    %1 = vector.load %arg2[%c0_1, %c0_2] : memref<128x128xf32, #tpu.memory_space<vmem>>, vector<128x128xf32>
    %cst = arith.constant dense<0.000000e+00> : vector<8x128xf32>
    %2 = tpu.matmul %0, %1, %cst {dimension_numbers = #tpu.dot_dimension_numbers<[1], [0], [0], [1], [0, 0, 1, 1], [], []>} : vector<8x128xf32>, vector<128x128xf32>, vector<8x128xf32> -> vector<8x128xf32>
    %cst_3 = arith.constant 0.000000e+00 : f32
    %3 = vector.broadcast %cst_3 : f32 to vector<8x128xf32>
    %4 = arith.maximumf %2, %3 : vector<8x128xf32>
    %c0_4 = arith.constant 0 : index
    %c0_5 = arith.constant 0 : index
    %5 = vector.load %arg3[%c0_4, %c0_5] : memref<8x128xf32, #tpu.memory_space<vmem>>, vector<8x128xf32>
    tpu.vector_store %arg3[%c0_4, %c0_5], %4 {strides = array<i32>} : memref<8x128xf32, #tpu.memory_space<vmem>>, vector<8x128xf32>,
    return
  }
  func.func @transform_0(%arg0: i32) -> (i32, i32) {
    %c0_i32 = arith.constant 0 : i32
    %c0_i32_0 = arith.constant 0 : i32
    return %arg0, %c0_i32 : i32, i32
  }
  func.func @transform_1(%arg0: i32) -> (i32, i32) {
    %c0_i32 = arith.constant 0 : i32
    %c0_i32_0 = arith.constant 0 : i32
    %c0_i32_1 = arith.constant 0 : i32
    return %c0_i32, %c0_i32_0 : i32, i32
  }
  func.func @transform_2(%arg0: i32) -> (i32, i32) {
    %c0_i32 = arith.constant 0 : i32
    %c0_i32_0 = arith.constant 0 : i32
    return %arg0, %c0_i32 : i32, i32
  }
}

</mosaic_0001>

<bundles_post_ra>
// kernel: tpu_custom_call.1
= control target key start
LH: loop header
LB: loop body
LE: loop exit
PB: predicated region body
PF: predicated region fallthrough
CT: control target
= control target key end

     0   :  { %7 = vsyncpa [#allocation3], 0  ;;  %s365_s0 = inlined_call_operand.hbm [shape: f32[8,128], index: 0, kind: input, shape index: {}]   ;;  %s366_s1 = inlined_call_operand.hbm [shape: f32[128,128], index: 1, kind: input, shape index: {}]   ;;  %s367_s2 = inlined_call_operand.hbm [shape: f32[8,128], index: 2, kind: output, shape index: {}]  }
   0x1   :  { %8 = vsyncpa [#allocation6], 0 }
   0x2   :  { %9 = vsyncpa [#allocation4], 0  ;;  %s299_s9 = smov [#allocation2]   ;;  %s300_s11 = smov [#allocation5]  }
   0x3   :  { %s16_s10 = sshll.u32 %s299_s9, 4  ;;  %s25_s12 = sshll.u32 %s300_s11, 4  ;;  %s17_s10 = int_to_ptr.vmem [resolvable:$true] %s16_s10  ;;  %s322_s12 = int_to_ptr.vmem [resolvable:$true] %s25_s12 }
   0x4   :  { %s227_s15 = scalar_lea.hbm %s365_s0, 128 }
   0x5   :  { %p228_p0 = scmp.ne.s32.totalorder %s365_s0, %s227_s15  ;;  %p231_p1 = scmp.lt.u32.totalorder %s227_s15, %s365_s0 }
   0x7   :  { %p233_p2 = pnand %p231_p1, %p228_p0 }
   0x9   :  { %236 = shalt.err (!%p233_p2)
}
   0xa   :  { %s237_s20 = scalar_lea.vmem %s17_s10, 128  ;;  %p242_p4 = scmp.lt.s32.totalorder %s17_s10, %s17_s10 }
   0xb   :  { %p238_p3 = scmp.ne.s32.totalorder %s17_s10, %s237_s20  ;;  %p243_p5 = scmp.lt.s32.totalorder %s237_s20, %s237_s20 }
   0xd   :  { %p244_p6 = por %p243_p5, %p242_p4 }
   0xf   :  { %p245_p7 = pnand %p244_p6, %p238_p3 }
  0x11   :  { %248 = shalt.err (!%p245_p7)
}
  0x12   :  { %19 = dma.hbm_to_vmem [thread:$0]  %s365_s0, 128, %s17_s10, [#allocation3]  }
  0x13   :  { %s249_s25 = scalar_lea.hbm %s366_s1, 2048 }
  0x14   :  { %p250_p8 = scmp.ne.s32.totalorder %s366_s1, %s249_s25  ;;  %p253_p9 = scmp.lt.u32.totalorder %s249_s25, %s366_s1 }
  0x16   :  { %p255_p10 = pnand %p253_p9, %p250_p8 }
  0x18   :  { %258 = shalt.err (!%p255_p10)
}
  0x19   :  { %s259_s30 = scalar_lea.vmem %s322_s12, 2048  ;;  %p264_p12 = scmp.lt.s32.totalorder %s322_s12, %s322_s12 }
  0x1a   :  { %p260_p11 = scmp.ne.s32.totalorder %s322_s12, %s259_s30  ;;  %p265_p13 = scmp.lt.s32.totalorder %s259_s30, %s259_s30 }
  0x1c   :  { %p266_p0 = por %p265_p13, %p264_p12 }
  0x1e   :  { %p267_p1 = pnand %p266_p0, %p260_p11 }
  0x20   :  { %270 = shalt.err (!%p267_p1)
}
  0x21   :  { %s301_s0 = smov 128   ;;  %s302_s3 = smov 8  }
  0x22   :  { %31 = dma.hbm_to_vmem [thread:$0]  %s366_s1, 2048, %s322_s12, [#allocation6], %s301_s0, %s301_s0, %s302_s3  }
  0x23   :  { %293 = dma.done.wait [#allocation3], 128  }
  0x24   :  { %294 = vsyncadd [#allocation3], 4294967168 }
  0x25   :  { %295 = dma.done.wait [#allocation6], 2048  }
  0x26   :  { %296 = vsyncadd [#allocation6], 4294965248  ;;  %v303_v0 = vmov 0.0|0.0   ;;  %vm304_vm0 = vmmov 0   ;;  %v305_v1 = vmov 0.0   ;;  %v39_v2 = vld [vmem:[#allocation5] sm:$0xff] }
  0x27   :  { %195 = vmatprep.subr.bf16.mxu0 %v303_v0  ;;  %192 = vmatprep.mubr.msk.f32.mxu0 %vm304_vm0, %v305_v1  ;;  %v40_v3 = vld [vmem:[#allocation5 + $0x8] sm:$0xff]  ;;  %v41_v4 = vld [vmem:[#allocation5 + $0x10] sm:$0xff]  ;;  %v42_v6 = vld [vmem:[#allocation5 + $0x18] sm:$0xff]  ;;  %s306_s1 = smov [#allocation7]  }
  0x28   :  { %v196_v5 = vpack.c.bf16 %v40_v3, %v39_v2  ;;  %v199_v7 = vpack.c.bf16 %v42_v6, %v41_v4  ;;  %v43_v8 = vld [vmem:[#allocation5 + $0x20] sm:$0xff]  ;;  %v44_v9 = vld [vmem:[#allocation5 + $0x28] sm:$0xff]  ;;  %v45_v11 = vld [vmem:[#allocation5 + $0x30] sm:$0xff]  ;;  %s133_s6 = sshll.u32 %s306_s1, 4  ;;  %s134_s6 = int_to_ptr.vmem [resolvable:$true] %s133_s6 }
  0x29   :  { %v202_v10 = vpack.c.bf16 %v44_v9, %v43_v8  ;;  %v46_v12 = vld [vmem:[#allocation5 + $0x38] sm:$0xff]  ;;  %v47_v14 = vld [vmem:[#allocation5 + $0x40] sm:$0xff]  ;;  %v48_v15 = vld [vmem:[#allocation5 + $0x48] sm:$0xff]  ;;  %s271_s7 = scalar_lea.vmem %s134_s6, 128  ;;  %p276_p3 = scmp.lt.s32.totalorder %s134_s6, %s134_s6 }
  0x2a   :  { %197 = vmatpush3.bf16.msra.mxu0 %v196_v5  ;;  %v205_v13 = vpack.c.bf16 %v46_v12, %v45_v11  ;;  %v208_v16 = vpack.c.bf16 %v48_v15, %v47_v14  ;;  %v49_v17 = vld [vmem:[#allocation5 + $0x50] sm:$0xff]  ;;  %v50_v18 = vld [vmem:[#allocation5 + $0x58] sm:$0xff]  ;;  %v51_v20 = vld [vmem:[#allocation5 + $0x60] sm:$0xff]  ;;  %p272_p2 = scmp.ne.s32.totalorder %s134_s6, %s271_s7  ;;  %p277_p4 = scmp.lt.s32.totalorder %s271_s7, %s271_s7 }
  0x2b   :  { %198 = vmatprep.subr.bf16.mxu0 %v303_v0  ;;  %v211_v19 = vpack.c.bf16 %v50_v18, %v49_v17  ;;  %v52_v21 = vld [vmem:[#allocation5 + $0x68] sm:$0xff]  ;;  %v53_v23 = vld [vmem:[#allocation5 + $0x70] sm:$0xff]  ;;  %v54_v24 = vld [vmem:[#allocation5 + $0x78] sm:$0xff] }
  0x2c   :  { %v214_v22 = vpack.c.bf16 %v52_v21, %v51_v20  ;;  %v217_v25 = vpack.c.bf16 %v54_v24, %v53_v23  ;;  %v38_v26 = vld [vmem:[#allocation2] sm:$0xff]  ;;  %p278_p5 = por %p277_p4, %p276_p3 }
  0x2e   :  { %200 = vmatpush3.bf16.msra.mxu0 %v199_v7  ;;  %p279_p6 = pnand %p278_p5, %p272_p2 }
  0x2f   :  { %201 = vmatprep.subr.bf16.mxu0 %v303_v0 }
  0x32   :  { %203 = vmatpush3.bf16.msra.mxu0 %v202_v10 }
  0x33   :  { %204 = vmatprep.subr.bf16.mxu0 %v303_v0 }
  0x36   :  { %206 = vmatpush3.bf16.msra.mxu0 %v205_v13 }
  0x37   :  { %207 = vmatprep.subr.bf16.mxu0 %v303_v0 }
  0x3a   :  { %209 = vmatpush3.bf16.msra.mxu0 %v208_v16 }
  0x3b   :  { %210 = vmatprep.subr.bf16.mxu0 %v303_v0 }
  0x3e   :  { %212 = vmatpush3.bf16.msra.mxu0 %v211_v19 }
  0x3f   :  { %213 = vmatprep.subr.bf16.mxu0 %v303_v0 }
  0x42   :  { %215 = vmatpush3.bf16.msra.mxu0 %v214_v22 }
  0x43   :  { %216 = vmatprep.subr.bf16.mxu0 %v303_v0 }
  0x46   :  { %218 = vmatpush3.bf16.msra.mxu0 %v217_v25 }
  0x49   :  { %193 = vmatmul.mubr.f32.vlgmr.msra.gmra.mrb[0].mxu0 %v38_v26 }
 0x11c   :  { %v121_v27 = vpop.f32.mrb[0].mxu0 }
 0x11d   :  { %v125_v28 = vmax.f32 %v121_v27, 0.0  ;;  %v194_v29 = vpop.f32.mrb[1].mxu0 }
 0x11f   :  { %126 = vst [vmem:[#allocation7] sm:$0xff] %v125_v28 }
 0x120   :  { %282 = shalt.err (!%p279_p6)
}
 0x121   :  { %s283_s10 = scalar_lea.hbm %s367_s2, 128 }
 0x122   :  { %p284_p7 = scmp.ne.s32.totalorder %s367_s2, %s283_s10  ;;  %p287_p8 = scmp.lt.u32.totalorder %s283_s10, %s367_s2 }
 0x124   :  { %p289_p9 = pnand %p287_p8, %p284_p7 }
 0x126   :  { %292 = shalt.err (!%p289_p9)
}
 0x127   :  { %136 = dma.vmem_to_hbm [thread:$0]  %s134_s6, 128, %s367_s2, [#allocation4]  }
 0x128   :  { %297 = dma.done.wait [#allocation4], 128  }
 0x129   :  { %298 = vsyncadd [#allocation4], 4294967168 }
 0x12a   :  { %140 = vsyncpa [#allocation3], 1 }
 0x12b   :  { %141 = vsyncpa [#allocation6], 1 }
 0x12c   :  { %142 = vsyncpa [#allocation4], 1 }

</bundles_post_ra>
